<compile_context>
chip_gen: v7x
topology: tpu7x:2x2x1
jax: 0.10.0
libtpu: 0.0.40
codegen_flags: <defaults>
</compile_context>

<pallas_src>
import jax
import jax.numpy as jnp
from jax import lax
from jax.experimental import pallas as pl
from jax.experimental.pallas import tpu as pltpu


def _round_up(v, m):
    return ((v + m - 1) // m) * m


def _largest_divisor_leq(n, cap):
    for d in range(max(1, min(n, cap)), 0, -1):
        if n % d == 0:
            return d
    return 1


class Capsules2211Pallas:
    """JAX/Pallas port of Capsules2_2_1_1: [b,ch_in,n_in,h,w] -> [b,ch_out,n_out,h1,w1]."""

    def __init__(self, ch_in, n_in, ch_out, n_out, kernel_size=3, stride=1,
                 padding=0, dilation=1, key=None, use_bf16=False):
        self.ch_in, self.n_in = ch_in, n_in
        self.ch_out, self.n_out = ch_out, n_out
        self.k, self.stride = kernel_size, stride
        self.padding, self.dilation = padding, dilation
        self.use_bf16 = use_bf16
        if key is None:
            key = jax.random.PRNGKey(0)
        k1, k2, k3, k4 = jax.random.split(key, 4)
        K = kernel_size
        # conv_vector: nn.Conv2d(ch_in*n_in, ch_in*n_out, 1, groups=ch_in, bias=True)
        self.w_vec = jax.random.normal(k1, (ch_in * n_out, n_in, 1, 1), jnp.float32) * 0.1
        self.b_vec = jax.random.normal(k2, (ch_in * n_out,), jnp.float32) * 0.1
        # conv_channel: nn.Conv2d(n_out*ch_in, n_out*ch_out, K, groups=n_out, bias=True)
        self.w_ch = jax.random.normal(k3, (n_out * ch_out, ch_in, K, K), jnp.float32) * 0.1
        self.b_ch = jax.random.normal(k4, (n_out * ch_out,), jnp.float32) * 0.1

        # Split n_out into n_gt group tiles (inner grid axis). n_gt = 2 keeps the
        # two v7x TensorCores busy when the batch axis collapses to one tile,
        # while the Gc-way group stacking inside a tile keeps the matmuls large
        # and the im2col taps sublane-aligned (Gc*ci and Gc*co multiples of 8).
        if (n_out % 2 == 0 and ((n_out // 2) * ch_in) % 8 == 0
                and ((n_out // 2) * ch_out) % 8 == 0):
            n_gt = 2
        else:
            n_gt = 1
        self.n_gt = n_gt
        self.Gc = Gc = n_out // n_gt
        self.Kin = Kin = ch_in * n_in
        self.KKg = KKg = K * K * Gc * ch_in

        # conv_vector: stack Gc capsule groups into one block-diagonal matrix
        # [Gc*ci, ci*ni]; bias rides along as the last column (no tiny bias DMAs).
        #   row (n_local, c), col (c', j): nonzero iff c' == c.
        w1g = self.w_vec.reshape(ch_in, n_out, n_in).transpose(1, 0, 2)     # [n, c, j]
        w1g = w1g.reshape(n_gt, Gc, ch_in, n_in)                            # [g, nl, c, j]
        eye_c = jnp.eye(ch_in, dtype=jnp.float32)
        w1bd = jnp.einsum('ce,gncj->gncej', eye_c, w1g).reshape(n_gt, Gc * ch_in, Kin)
        b1 = self.b_vec.reshape(ch_in, n_out).T.reshape(n_gt, Gc * ch_in, 1)
        self.w1a = jnp.concatenate([w1bd, b1], axis=-1)                     # [g, Gc*ci, Kin+1]

        # conv_channel: tap-major, group-block-diagonal [Gc*co, K*K*Gc*ci]
        # matching the patch-row layout (tap, n_local, c'), + bias column.
        w2r = self.w_ch.reshape(n_out, ch_out, ch_in, K, K).transpose(0, 1, 3, 4, 2)
        w2r = w2r.reshape(n_gt, Gc, ch_out, K * K, ch_in)                   # [g, nl, co, tap, ci]
        eye_g = jnp.eye(Gc, dtype=jnp.float32)
        w2bd = jnp.einsum('nm,gnctj->gnctmj', eye_g, w2r).reshape(n_gt, Gc * ch_out, KKg)
        b2 = self.b_ch.reshape(n_out, ch_out).reshape(n_gt, Gc * ch_out, 1)
        self.w2a = jnp.concatenate([w2bd, b2], axis=-1)                     # [g, Gc*co, KKg+1]

    # ------------------------------------------------------------------ forward
    def __call__(self, x):
        B, ci, ni, H, W = x.shape
        assert ci == self.ch_in and ni == self.n_in
        co, no_, K = self.ch_out, self.n_out, self.k
        s, p, d = self.stride, self.padding, self.dilation
        n_gt, Gc = self.n_gt, self.Gc
        Kin, KKg = self.Kin, self.KKg

        Hp, Wp = H + 2 * p, W + 2 * p
        H1 = (Hp - d * (K - 1) - 1) // s + 1
        W1 = (Wp - d * (K - 1) - 1) // s + 1
        assert H1 > 0 and W1 > 0
        Wrow = Wp                                   # flat row width of the padded image
        rows_out = (H1 - 1) * s + 1                 # stride-1 anchor rows the wrapper reads
        Lout = rows_out * Wrow                      # per-batch window extracted by the wrapper
        shift_max = (K - 1) * d * (Wrow + 1)        # largest im2col tap shift
        pad_shift = _round_up(shift_max, 128)       # lane-aligned tap headroom
        L_in = _round_up(Hp * Wp, 128) + pad_shift  # per-batch flat pixel stride (mult of 128)

        cdtype = jnp.bfloat16 if self.use_bf16 else jnp.float32
        isz = jnp.dtype(cdtype).itemsize

        # ---- per-generation batch-tile budget (v5e/v6e: 128 MiB VMEM, v7x: 64 MiB) --
        try:
            vmem_cap = int(pltpu.get_tpu_info().vmem_capacity_bytes)
        except Exception:
            vmem_cap = 64 * 1024 * 1024

        def vmem_est(bt):
            nlane = bt * L_in
            ncol = nlane - pad_shift
            return (2 * Kin * nlane * isz                 # x block (double buffered)
                    + Gc * ci * nlane * (4 + isz)         # nv (f32) + compute-dtype copy
                    + KKg * ncol * isz                    # patch matrix
                    + 3 * Gc * co * ncol * 4              # of + out block (double buffered)
                    + 2 * nlane * 4)                      # mask block (double buffered)

        budget = vmem_cap // 2
        bt = B
        while bt > 1 and vmem_est(bt) > budget:
            bt -= 1
        Bt = _largest_divisor_leq(B, bt)
        n_bt = B // Bt
        Nlane = Bt * L_in
        Ncol = Nlane - pad_shift                    # matmul/store width (multiple of 128)
        vmem_limit = int(min(vmem_cap * 0.9,
                             max(32 * 1024 * 1024, 2 * vmem_est(Bt))))

        # ---- caller-side input relayout: [B,ci,ni,H,W] -> [ci*ni, B*L_in] -----------
        xt = jnp.transpose(x, (1, 2, 0, 3, 4))                      # [ci, ni, B, H, W]
        if p > 0:
            xt = jnp.pad(xt, ((0, 0), (0, 0), (0, 0), (p, p), (p, p)))
        xt = xt.reshape(Kin, B, Hp * Wp)
        if L_in > Hp * Wp:
            xt = jnp.pad(xt, ((0, 0), (0, 0), (0, L_in - Hp * Wp)))
        x_flat = xt.reshape(Kin, B * L_in).astype(cdtype)

        # Valid-pixel mask: zeroes the conv-padding ring AND the lane-pad tail.
        # Applied unconditionally so the conv_vector bias never leaks through taps.
        fidx = jnp.arange(L_in, dtype=jnp.int32)
        hh, ww = fidx // Wrow, fidx % Wrow
        mrow = ((hh >= p) & (hh < Hp - p) & (ww >= p) & (ww < Wp - p)).astype(jnp.float32)
        mask = jnp.tile(mrow, B)[None, :]                           # [1, B*L_in]

        w1a = self.w1a.astype(cdtype)
        w2a = self.w2a.astype(cdtype)

        def kernel(x_ref, m_ref, w1_ref, w2_ref, o_ref):
            # x_ref : [Kin, Nlane]        resident across the inner group-tile loop
            # m_ref : [1, Nlane]          valid-pixel mask
            # w1_ref: [1, Gc*ci, Kin+1]   stacked block-diag conv_vector weights | bias
            # w2_ref: [1, Gc*co, KKg+1]   stacked block-diag conv_channel weights | bias
            # o_ref : [Gc*co, Ncol]       lane-dense output slab (permutes + H1xW1
            #                             window handled by out spec + wrapper)
            xv = x_ref[...]
            w1 = w1_ref[0, :, :Kin]
            b1 = w1_ref[0, :, Kin:].astype(jnp.float32)
            # conv_vector for all Gc groups: one stacked block-diagonal MXU matmul
            nv = jnp.dot(w1, xv, preferred_element_type=jnp.float32) + b1
            nv = (nv * m_ref[...]).astype(cdtype)                   # [Gc*ci, Nlane]
            # on-chip im2col over the whole batch-tile lane axis: K*K static slices
            # TODO(synk): if XLU saturates, use K row slices + pltpu.roll(kw*d) instead.
            taps = [nv[:, (kh * Wrow + kw) * d:(kh * Wrow + kw) * d + Ncol]
                    for kh in range(K) for kw in range(K)]
            patches = jnp.concatenate(taps, axis=0)                 # [KKg, Ncol]
            w2 = w2_ref[0, :, :KKg]
            b2 = w2_ref[0, :, KKg:].astype(jnp.float32)
            # conv_channel for all Gc groups and all Bt batches: one MXU matmul
            of = jnp.dot(w2, patches, preferred_element_type=jnp.float32) + b2
            o_ref[...] = of.astype(o_ref.dtype)                     # unmasked dense store

        out_flat = pl.pallas_call(
            kernel,
            out_shape=jax.ShapeDtypeStruct((no_ * co, n_bt * Ncol), x.dtype),
            grid_spec=pltpu.PrefetchScalarGridSpec(
                num_scalar_prefetch=0,
                grid=(n_bt, n_gt),                       # group-tile axis innermost
                in_specs=[
                    pl.BlockSpec((Kin, Nlane), lambda bt_, g: (0, bt_)),
                    pl.BlockSpec((1, Nlane), lambda bt_, g: (0, bt_)),
                    pl.BlockSpec((1, Gc * ci, Kin + 1), lambda bt_, g: (g, 0, 0)),
                    pl.BlockSpec((1, Gc * co, KKg + 1), lambda bt_, g: (g, 0, 0)),
                ],
                out_specs=pl.BlockSpec((Gc * co, Ncol), lambda bt_, g: (g, bt_)),
            ),
            compiler_params=pltpu.CompilerParams(
                dimension_semantics=("parallel", "parallel"),
                vmem_limit_bytes=vmem_limit),
        )(x_flat, mask, w1a, w2a)

        # ---- cheap wrapper-side window extraction + final permute -------------------
        out = out_flat.reshape(no_, co, n_bt, Ncol)
        if Nlane > Ncol:
            out = jnp.pad(out, ((0, 0), (0, 0), (0, 0), (0, Nlane - Ncol)))
        out = out.reshape(no_, co, n_bt, Bt, L_in)[..., :Lout]
        out = out.reshape(no_, co, n_bt, Bt, rows_out, Wrow)
        out = out[..., ::s, ::s][..., :H1, :W1]                     # strided conv anchors
        out = out.reshape(no_, co, B, H1, W1).transpose(2, 1, 0, 3, 4)
        return out

    # --------------------------------------------------------------- reference
    def reference(self, x):
        """Pure JAX/XLA reference replicating the PyTorch forward exactly."""
        B = x.shape[0]
        H, W = x.shape[-2:]
        ci, ni, co, no_ = self.ch_in, self.n_in, self.ch_out, self.n_out
        dn = ('NCHW', 'OIHW', 'NCHW')
        xr = x.reshape(B, ci * ni, H, W)
        nv = lax.conv_general_dilated(
            xr, self.w_vec, (1, 1), 'VALID',
            feature_group_count=ci, dimension_numbers=dn)
        nv = nv + self.b_vec[None, :, None, None]
        nv = nv.reshape(B, ci, no_, H, W).transpose(0, 2, 1, 3, 4).reshape(
            B, no_ * ci, H, W)
        cm = lax.conv_general_dilated(
            nv, self.w_ch, (self.stride, self.stride),
            [(self.padding, self.padding), (self.padding, self.padding)],
            rhs_dilation=(self.dilation, self.dilation),
            feature_group_count=no_, dimension_numbers=dn)
        cm = cm + self.b_ch[None, :, None, None]
        H1, W1 = cm.shape[-2:]
        return cm.reshape(B, no_, co, H1, W1).transpose(0, 2, 1, 3, 4)


if __name__ == "__main__":
    key = jax.random.PRNGKey(0)
    kx, kp, kp2 = jax.random.split(key, 3)

    B, ch_in, n_in, ch_out, n_out, H, W = 2, 4, 8, 6, 8, 16, 16
    x = jax.random.normal(kx, (B, ch_in, n_in, H, W), jnp.float32)

    # primary config (matches the module defaults: K=3, stride=1, padding=0)
    mod = Capsules2211Pallas(ch_in, n_in, ch_out, n_out, kernel_size=3,
                             stride=1, padding=0, dilation=1, key=kp)
    out = jax.block_until_ready(mod(x))
    ref = jax.block_until_ready(mod.reference(x))
    assert out.shape == (B, ch_out, n_out, 14, 14), out.shape
    assert jnp.allclose(out, ref, atol=1e-4, rtol=1e-4), \
        f"max abs err {float(jnp.max(jnp.abs(out - ref)))}"

    # secondary config exercising the padded / strided path
    mod2 = Capsules2211Pallas(ch_in, n_in, ch_out, n_out, kernel_size=3,
                              stride=2, padding=1, dilation=1, key=kp2)
    out2 = jax.block_until_ready(mod2(x))
    ref2 = jax.block_until_ready(mod2.reference(x))
    assert out2.shape == ref2.shape, (out2.shape, ref2.shape)
    assert jnp.allclose(out2, ref2, atol=1e-4, rtol=1e-4), \
        f"max abs err {float(jnp.max(jnp.abs(out2 - ref2)))}"

    print("KERNEL_OK")
</pallas_src>

<mosaic_0001>
module attributes {stable_mosaic.version = 11 : i64} {
  func.func @kernel(%arg0: i32, %arg1: i32, %arg2: memref<32x768xf32, #tpu.memory_space<vmem>>, %arg3: memref<1x768xf32, #tpu.memory_space<vmem>>, %arg4: memref<1x16x33xf32, #tpu.memory_space<vmem>>, %arg5: memref<1x24x145xf32, #tpu.memory_space<vmem>>, %arg6: memref<24x640xf32, #tpu.memory_space<vmem>>) attributes {dimension_semantics = [#tpu.dimension_semantics<parallel>, #tpu.dimension_semantics<parallel>], iteration_bounds = array<i64: 1, 2>, scalar_prefetch = 0 : i64, scratch_operands = 0 : i64, tpu.core_type = #tpu.core_type<tc>, window_params = [{transform_indices = @transform_0, window_bounds = array<i64: 32, 768>}, {transform_indices = @transform_1, window_bounds = array<i64: 1, 768>}, {transform_indices = @transform_2, window_bounds = array<i64: 1, 16, 33>}, {transform_indices = @transform_3, window_bounds = array<i64: 1, 24, 145>}, {transform_indices = @transform_4, window_bounds = array<i64: 24, 640>}]} {
    %c0 = arith.constant 0 : index
    %c0_0 = arith.constant 0 : index
    %0 = vector.load %arg2[%c0, %c0_0] : memref<32x768xf32, #tpu.memory_space<vmem>>, vector<32x768xf32>
    %c0_1 = arith.constant 0 : index
    %c0_2 = arith.constant 0 : index
    %c0_3 = arith.constant 0 : index
    %1 = vector.load %arg4[%c0_1, %c0_2, %c0_3] : memref<1x16x33xf32, #tpu.memory_space<vmem>>, vector<1x16x32xf32>
    %2 = vector.shape_cast %1 : vector<1x16x32xf32> to vector<16x32xf32>
    %c0_4 = arith.constant 0 : index
    %c0_5 = arith.constant 0 : index
    %c32 = arith.constant 32 : index
    %3 = vector.load %arg4[%c0_4, %c0_5, %c32] : memref<1x16x33xf32, #tpu.memory_space<vmem>>, vector<1x16x1xf32>
    %4 = vector.shape_cast %3 : vector<1x16x1xf32> to vector<16x1xf32>
    %cst = arith.constant dense<0.000000e+00> : vector<16x768xf32>
    %5 = tpu.matmul %2, %0, %cst {dimension_numbers = #tpu.dot_dimension_numbers<[1], [0], [0], [1], [0, 0, 1, 1], [], []>} : vector<16x32xf32>, vector<32x768xf32>, vector<16x768xf32> -> vector<16x768xf32>
    %6 = vector.broadcast %4 : vector<16x1xf32> to vector<16x768xf32>
    %7 = arith.addf %5, %6 : vector<16x768xf32>
    %c0_6 = arith.constant 0 : index
    %c0_7 = arith.constant 0 : index
    %8 = vector.load %arg3[%c0_6, %c0_7] : memref<1x768xf32, #tpu.memory_space<vmem>>, vector<1x768xf32>
    %9 = vector.broadcast %8 : vector<1x768xf32> to vector<16x768xf32>
    %10 = arith.mulf %7, %9 : vector<16x768xf32>
    %11 = vector.extract_strided_slice %10 {offsets = [0, 0], sizes = [16, 640], strides = [1, 1]} : vector<16x768xf32> to vector<16x640xf32>
    %12 = vector.extract_strided_slice %10 {offsets = [0, 1], sizes = [16, 640], strides = [1, 1]} : vector<16x768xf32> to vector<16x640xf32>
    %13 = vector.extract_strided_slice %10 {offsets = [0, 2], sizes = [16, 640], strides = [1, 1]} : vector<16x768xf32> to vector<16x640xf32>
    %14 = vector.extract_strided_slice %10 {offsets = [0, 16], sizes = [16, 640], strides = [1, 1]} : vector<16x768xf32> to vector<16x640xf32>
    %15 = vector.extract_strided_slice %10 {offsets = [0, 17], sizes = [16, 640], strides = [1, 1]} : vector<16x768xf32> to vector<16x640xf32>
    %16 = vector.extract_strided_slice %10 {offsets = [0, 18], sizes = [16, 640], strides = [1, 1]} : vector<16x768xf32> to vector<16x640xf32>
    %17 = vector.extract_strided_slice %10 {offsets = [0, 32], sizes = [16, 640], strides = [1, 1]} : vector<16x768xf32> to vector<16x640xf32>
    %18 = vector.extract_strided_slice %10 {offsets = [0, 33], sizes = [16, 640], strides = [1, 1]} : vector<16x768xf32> to vector<16x640xf32>
    %19 = vector.extract_strided_slice %10 {offsets = [0, 34], sizes = [16, 640], strides = [1, 1]} : vector<16x768xf32> to vector<16x640xf32>
    %20 = tpu.concatenate %11, %12, %13, %14, %15, %16, %17, %18, %19 in 0 : vector<16x640xf32>, vector<16x640xf32>, vector<16x640xf32>, vector<16x640xf32>, vector<16x640xf32>, vector<16x640xf32>, vector<16x640xf32>, vector<16x640xf32>, vector<16x640xf32> -> vector<144x640xf32>
    %c0_8 = arith.constant 0 : index
    %c0_9 = arith.constant 0 : index
    %c0_10 = arith.constant 0 : index
    %21 = vector.load %arg5[%c0_8, %c0_9, %c0_10] : memref<1x24x145xf32, #tpu.memory_space<vmem>>, vector<1x24x144xf32>
    %22 = vector.shape_cast %21 : vector<1x24x144xf32> to vector<24x144xf32>
    %c0_11 = arith.constant 0 : index
    %c0_12 = arith.constant 0 : index
    %c144 = arith.constant 144 : index
    %23 = vector.load %arg5[%c0_11, %c0_12, %c144] : memref<1x24x145xf32, #tpu.memory_space<vmem>>, vector<1x24x1xf32>
    %24 = vector.shape_cast %23 : vector<1x24x1xf32> to vector<24x1xf32>
    %cst_13 = arith.constant dense<0.000000e+00> : vector<24x640xf32>
    %25 = tpu.matmul %22, %20, %cst_13 {dimension_numbers = #tpu.dot_dimension_numbers<[1], [0], [0], [1], [0, 0, 1, 1], [], []>} : vector<24x144xf32>, vector<144x640xf32>, vector<24x640xf32> -> vector<24x640xf32>
    %26 = vector.broadcast %24 : vector<24x1xf32> to vector<24x640xf32>
    %27 = arith.addf %25, %26 : vector<24x640xf32>
    %c0_14 = arith.constant 0 : index
    %c0_15 = arith.constant 0 : index
    %28 = vector.load %arg6[%c0_14, %c0_15] : memref<24x640xf32, #tpu.memory_space<vmem>>, vector<24x640xf32>
    tpu.vector_store %arg6[%c0_14, %c0_15], %27 {strides = array<i32>} : memref<24x640xf32, #tpu.memory_space<vmem>>, vector<24x640xf32>,
    return
  }
  func.func @transform_0(%arg0: i32, %arg1: i32) -> (i32, i32) {
    %c0_i32 = arith.constant 0 : i32
    %c0_i32_0 = arith.constant 0 : i32
    return %c0_i32, %arg0 : i32, i32
  }
  func.func @transform_1(%arg0: i32, %arg1: i32) -> (i32, i32) {
    %c0_i32 = arith.constant 0 : i32
    %c0_i32_0 = arith.constant 0 : i32
    return %c0_i32, %arg0 : i32, i32
  }
  func.func @transform_2(%arg0: i32, %arg1: i32) -> (i32, i32, i32) {
    %c0_i32 = arith.constant 0 : i32
    %c0_i32_0 = arith.constant 0 : i32
    %c0_i32_1 = arith.constant 0 : i32
    return %arg1, %c0_i32, %c0_i32_0 : i32, i32, i32
  }
  func.func @transform_3(%arg0: i32, %arg1: i32) -> (i32, i32, i32) {
    %c0_i32 = arith.constant 0 : i32
    %c0_i32_0 = arith.constant 0 : i32
    %c0_i32_1 = arith.constant 0 : i32
    return %arg1, %c0_i32, %c0_i32_0 : i32, i32, i32
  }
  func.func @transform_4(%arg0: i32, %arg1: i32) -> (i32, i32) {
    %c0_i32 = arith.constant 0 : i32
    return %arg1, %arg0 : i32, i32
  }
}

</mosaic_0001>

<bundles_post_ra>
// kernel: tpu_custom_call.1
= control target key start
LH: loop header
LB: loop body
LE: loop exit
PB: predicated region body
PF: predicated region fallthrough
CT: control target
= control target key end

     0   :  { %s2967_s0 = inlined_call_operand.hbm [shape: f32[32,768], index: 0, kind: input, shape index: {}]   ;;  %s2968_s1 = inlined_call_operand.hbm [shape: f32[1,768], index: 1, kind: input, shape index: {}]   ;;  %s2969_s2 = inlined_call_operand.hbm [shape: f32[2,16,33], index: 2, kind: input, shape index: {}]   ;;  %s2970_s3 = inlined_call_operand.hbm [shape: f32[2,24,145], index: 3, kind: input, shape index: {}]   ;;  %s2971_s4 = inlined_call_operand.hbm [shape: f32[48,640], index: 4, kind: output, shape index: {}]  }
   0x1   :  { %2984 = sst [smem:[#allocation16_spill]] %s2967_s0 }
   0x2   :  { %2985 = sst [smem:[#allocation17_spill]] %s2969_s2 }
   0x3   :  { %2986 = sst [smem:[#allocation18_spill]] %s2971_s4 }
   0x4   :  { %9 = vsyncpa [#allocation3], 0 }
   0x5   :  { %10 = vsyncpa [#allocation6], 0 }
   0x6   :  { %11 = vsyncpa [#allocation4], 0 }
   0x7   :  { %13 = vsyncpa [#allocation4 + $0x1], 0  ;;  %s2204_s15 = smov 0   ;;  %s2206_s16 = smov 0  }
   0x8   :  { %s2208_s17 = smov 0   ;;  %s2210_s18 = smov 0  }
   0x9   :  { %s2212_s19 = smov 0   ;;  %s2214_s20 = smov 0  }
   0xa LB: > { %2987 = sst [smem:[#allocation14_spill]] %s2132_s15  ;;  %s2235_s21 = sadd.s32 4294967295, %s2152_s20   ;;  %s2152_s20 = sphi %s2214_s20, %s19_s20   ;;  %s2148_s19 = sphi %s2212_s19, %s3022_s19   ;;  %s2144_s18 = sphi %s2210_s18, %s3021_s18   ;;  %s2140_s17 = sphi %s2208_s17, %s3020_s17   ;;  %s2136_s16 = sphi %s2206_s16, %s3019_s16   ;;  %s2132_s15 = sphi %s2204_s15, %s3018_s15  }
   0xb   : > { %s1434_s22 = sadd.s32 4294967294, %s2152_s20   ;;  %p97_p0 = scmp.ne.s32.totalorder %s2140_s17, %s2136_s16 }
   0xc   : > { %p98_p1 = scmp.eq.s32.totalorder %s2152_s20, 0  ;;  %p103_p2 = scmp.ne.s32.totalorder %s2136_s16, %s2132_s15 }
   0xd   : > { %p2972_p3 = scmp.eq.s32.totalorder %s2235_s21, 0  ;;  %p155_p4 = scmp.eq.s32.totalorder %s2235_s21, 1 }
   0xe   : > { %p2246_p5 = por %p98_p1, %p97_p0  ;;  %p161_p6 = scmp.eq.s32.totalorder %s1434_s22, 1 }
   0xf   : > { %p2252_p7 = por %p2972_p3, %p103_p2  ;;  %p2256_p8 = por %p155_p4, %p97_p0 }
  0x10   : > { %p2260_p9 = por %p161_p6, %p103_p2  ;;  %p1435_p10 = scmp.ge.s32.totalorder %s2152_s20, 1 }
  0x11   : > { %s2989_s25 = scalar_select %p2252_p7, 1, 0 }
  0x12   : > { %s2990_s26 = scalar_select %p2256_p8, 1, 0 }
  0x13   : > { %s2991_s27 = scalar_select %p2260_p9, 1, 0 }
  0x14   : > { %p168_p11 = scmp.lt.s32.totalorder %s2152_s20, 3  ;;  %s2154_s29 = smov [#allocation2]  }
  0x15   : > { %2992 = sst [smem:[#allocation15_spill]] %s2991_s27  ;;  %s183_s30 = sshll.u32 %s2154_s29, 4  ;;  %s2270_s30 = int_to_ptr.vmem [resolvable:$true] %s183_s30 }
  0x16   : > { %p2266_p12 = pnand %p1435_p10, %p168_p11  ;;  %p1628_p1 = scmp.lt.s32.totalorder %s2152_s20, 2 }
  0x17   : > { %s28_s7 = sadd.s32 1, %s2148_s19  ;;  %s2997_s0 = sld [smem:[#allocation16_spill]] }
  0x18   : > { %s2993_s28 = scalar_select %p2266_p12, 1, 0 }
  0x19   : > { %p1608_p13 = pneg %p2266_p12  ;;  %p2284_p4 = pnand %p1628_p1, %p2246_p5 }
  0x1a   : > { %p2289_p6 = scmp.ge.s32.totalorder %s28_s7, 2 }
  0x1b   : > { %p2278_p2 = pnand %p1608_p13, %p2972_p3 }
  0x1c   : > { %s2995_s6 = scalar_select %p2284_p4, 1, 0 }
  0x1d   : > { %s1946_s11 = scalar_lea.hbm %s2997_s0, 3072  ;;  %p2979_p11 = pneg %p2278_p2 }
  0x1e   : > { %p1947_p10 = scmp.ne.s32.totalorder %s2997_s0, %s1946_s11  ;;  %p1953_p1 = scmp.lt.u32.totalorder %s1946_s11, %s2997_s0 }
  0x20   : > { %p1949_p5 = pnand %p2979_p11, %p1947_p10 }
  0x22   : > { %p1950_p13 = pneg %p1949_p5 }
  0x24   : > { %p1955_p0 = pnand %p1953_p1, %p1950_p13 }
  0x26   : > { %1958 = shalt.err (!%p1955_p0)
}
  0x27   : > { %s1959_s24 = scalar_lea.vmem %s2270_s30, 3072  ;;  %p1967_p7 = scmp.lt.s32.totalorder %s2270_s30, %s2270_s30 }
  0x28   : > { %p1960_p3 = scmp.ne.s32.totalorder %s2270_s30, %s1959_s24  ;;  %p1968_p10 = scmp.lt.s32.totalorder %s1959_s24, %s1959_s24 }
  0x2a   : > { %p1962_p9 = pnand %p1960_p3, %p2979_p11  ;;  %p1969_p5 = por %p1968_p10, %p1967_p7 }
  0x2c   : > { %p1963_p8 = pneg %p1962_p9 }
  0x2e   : > { %p1970_p12 = pnand %p1969_p5, %p1963_p8 }
  0x30   : > { %1973 = shalt.err (!%p1970_p12)
}
  0x31   : > { %s2155_s29 = smov 768   ;;  %s2156_s9 = smov 48  }
  0x32   : > { %1611 = dma.hbm_to_vmem [thread:$0]  (!%p2278_p2), %s2997_s0, 3072, %s2270_s30, [#allocation3], %s2155_s29, %s2155_s29, %s2156_s9  }
  0x33   : > { %s211_s12 = sand.u32 1, %s2152_s20   ;;  %s3024_s7 = smov (%p2289_p6, %s28_s7), 0 }
  0x34   : > { %s213_s13 = sand.u32 1, %s2140_s17   ;;  %s87_s14 = ssub.s32 %s2148_s19, %s3024_s7 }
  0x35   : > { %s1439_s22 = sshll.u32 %s213_s13, 4  ;;  %p88_p3 = scmp.eq.s32.totalorder %s87_s14, 0 }
  0x36   : > { %s1465_s24 = sshll.u32 %s2148_s19, 8  ;;  %s215_s23 = scalar_lea.vmem [#allocation7], %s1439_s22 }
  0x37   : > { %s222_s27 = sshll.u32 %s215_s23, 4  ;;  %s2998_s15 = sadd.s32 1, %s2140_s17  ;;  %s2341_s27 = int_to_ptr.vmem [resolvable:$true] %s222_s27 }
  0x38   : > { %s2334_s4 = scalar_select %p88_p3, %s2140_s17, %s2998_s15  }
  0x39   : > { %s2999_s2 = sld [smem:[#allocation17_spill]]  ;;  %s2343_s8 = scalar_lea.sflag [#allocation3], %s211_s12 }
  0x3a   : > { %p2980_p8 = pneg %p2284_p4 }
  0x3f   : > { %s2339_s29 = scalar_lea.hbm %s2999_s2, %s1465_s24  ;;  %s1979_s11 = scalar_lea.hbm %s2999_s2, 512 }
  0x40   : > { %s1974_s9 = scalar_lea.hbm %s2339_s29, 256  ;;  %p1980_p0 = scmp.lt.u32.totalorder %s2339_s29, %s2999_s2 }
  0x41   : > { %p1975_p7 = scmp.ne.s32.totalorder %s2339_s29, %s1974_s9  ;;  %p1981_p6 = scmp.lt.u32.totalorder %s1979_s11, %s1974_s9 }
  0x42   : > { %p1983_p1 = scmp.lt.u32.totalorder %s1974_s9, %s2339_s29 }
  0x43   : > { %p1977_p9 = pnand %p2980_p8, %p1975_p7  ;;  %p1982_p13 = por %p1981_p6, %p1980_p0 }
  0x45   : > { %p1978_p12 = pneg %p1977_p9  ;;  %p1984_p10 = por %p1983_p1, %p1982_p13 }
  0x47   : > { %p1985_p5 = pnand %p1984_p10, %p1978_p12 }
  0x49   : > { %1988 = shalt.err (!%p1985_p5)
}
  0x4a   : > { %s1989_s12 = scalar_lea.vmem %s2341_s27, 256  ;;  %s2157_s24 = smov [#allocation7]  }
  0x4b   : > { %p1990_p3 = scmp.ne.s32.totalorder %s2341_s27, %s1989_s12  ;;  %s1994_s10 = sshll.u32 %s2157_s24, 4  ;;  %s1995_s10 = int_to_ptr.vmem [resolvable:$false] %s1994_s10 }
  0x4c   : > { %s1996_s30 = scalar_lea.vmem %s1995_s10, 512  ;;  %p1997_p11 = scmp.lt.s32.totalorder %s2341_s27, %s1995_s10 }
  0x4d   : > { %p1992_p7 = pnand %p1990_p3, %p2980_p8  ;;  %p1998_p0 = scmp.lt.s32.totalorder %s1996_s30, %s1989_s12 }
  0x4f   : > { %p1993_p9 = pneg %p1992_p7  ;;  %p1999_p6 = por %p1998_p0, %p1997_p11 }
  0x51   : > { %p2000_p13 = pnand %p1999_p6, %p1993_p9 }
  0x53   : > { %2003 = shalt.err (!%p2000_p13)
}
  0x54   : > { %s2158_s9 = smov 128   ;;  %s2159_s15 = smov 8  }
  0x55   : > { %1618 = dma.hbm_to_vmem [thread:$0]  (!%p2284_p4), %s2339_s29, 256, %s2341_s27, %s2343_s8, %s2158_s9, %s2158_s9, %s2159_s15  }
  0x56   : > { %s1589_s23 = smul.u32 48, %s213_s13  ;;  %s2160_s11 = smov [#allocation5]  }
  0x57   : > { %s200_s14 = sshll.u32 %s2160_s11, 4  ;;  %s1590_s22 = smul.u32 768, %s2148_s19  ;;  %s201_s14 = int_to_ptr.vmem [resolvable:$true] %s200_s14 }
  0x58   : > { %s2004_s10 = scalar_lea.hbm %s2968_s1, 96  ;;  %p3000_p12 = pneg %p2278_p2 }
  0x59   : > { %p2005_p11 = scmp.ne.s32.totalorder %s2968_s1, %s2004_s10  ;;  %p2011_p5 = scmp.lt.u32.totalorder %s2004_s10, %s2968_s1 }
  0x5b   : > { %p2007_p1 = pnand %p2005_p11, %p3000_p12 }
  0x5d   : > { %p2008_p10 = pneg %p2007_p1 }
  0x5f   : > { %p2013_p3 = pnand %p2011_p5, %p2008_p10 }
  0x61   : > { %2016 = shalt.err (!%p2013_p3)
}
  0x62   : > { %s2017_s13 = scalar_lea.vmem %s201_s14, 96  ;;  %p3001_p9 = pmov %p3000_p12 }
  0x63   : > { %p2018_p7 = scmp.ne.s32.totalorder %s201_s14, %s2017_s13  ;;  %p2025_p13 = scmp.lt.s32.totalorder %s201_s14, %s201_s14 }
  0x64   : > { %p2026_p8 = scmp.lt.s32.totalorder %s2017_s13, %s2017_s13 }
  0x65   : > { %p2020_p0 = pnand %p2018_p7, %p3001_p9 }
  0x66   : > { %p2027_p4 = por %p2026_p8, %p2025_p13 }
  0x67   : > { %p2021_p6 = pneg %p2020_p0 }
  0x69   : > { %p2028_p11 = pnand %p2027_p4, %p2021_p6 }
  0x6b   : > { %2031 = shalt.err (!%p2028_p11)
}
  0x6c   : > { %1614 = dma.hbm_to_vmem [thread:$0]  (!%p2278_p2), %s2968_s1, 96, %s201_s14, [#allocation6]  }
  0x6d   : > { %s2397_s15 = scalar_lea.hbm %s2970_s3, %s1590_s22  ;;  %s236_s11 = scalar_lea.vmem [#allocation8], %s1589_s23 }
  0x6e   : > { %s243_s12 = sshll.u32 %s236_s11, 4  ;;  %s2032_s24 = scalar_lea.hbm %s2397_s15, 768  ;;  %s2399_s12 = int_to_ptr.vmem [resolvable:$true] %s243_s12 }
  0x6f   : > { %p2033_p4 = scmp.ne.s32.totalorder %s2397_s15, %s2032_s24  ;;  %p3002_p8 = scmp.ne.s32.totalorder %s2995_s6, 0 }
  0x70   : > { %s2037_s10 = scalar_lea.hbm %s2970_s3, 1536  ;;  %p2038_p2 = scmp.lt.u32.totalorder %s2397_s15, %s2970_s3 }
  0x71   : > { %p3003_p12 = pneg %p3002_p8  ;;  %p2039_p5 = scmp.lt.u32.totalorder %s2037_s10, %s2032_s24 }
  0x72   : > { %p2041_p7 = scmp.lt.u32.totalorder %s2032_s24, %s2397_s15 }
  0x73   : > { %p2035_p1 = pnand %p2033_p4, %p3003_p12  ;;  %p2040_p3 = por %p2039_p5, %p2038_p2 }
  0x75   : > { %p2036_p10 = pneg %p2035_p1  ;;  %p2042_p9 = por %p2041_p7, %p2040_p3 }
  0x77   : > { %p2043_p0 = pnand %p2042_p9, %p2036_p10 }
  0x79   : > { %2046 = shalt.err (!%p2043_p0)
}
  0x7a   : > { %s2047_s23 = scalar_lea.vmem %s2399_s12, 768  ;;  %p3004_p13 = pmov %p3003_p12 }
  0x7b   : > { %p2048_p6 = scmp.ne.s32.totalorder %s2399_s12, %s2047_s23  ;;  %s2161_s27 = smov [#allocation8]  }
  0x7c   : > { %s2052_s13 = sshll.u32 %s2161_s27, 4  ;;  %s2053_s13 = int_to_ptr.vmem [resolvable:$false] %s2052_s13 }
  0x7d   : > { %p2050_p11 = pnand %p2048_p6, %p3004_p13  ;;  %s2054_s0 = scalar_lea.vmem %s2053_s13, 1536 }
  0x7e   : > { %p2055_p12 = scmp.lt.s32.totalorder %s2399_s12, %s2053_s13  ;;  %p2056_p1 = scmp.lt.s32.totalorder %s2054_s0, %s2047_s23 }
  0x7f   : > { %p2051_p4 = pneg %p2050_p11 }
  0x80   : > { %p2057_p2 = por %p2056_p1, %p2055_p12 }
  0x82   : > { %p2058_p5 = pnand %p2057_p2, %p2051_p4 }
  0x84   : > { %2061 = shalt.err (!%p2058_p5)
}
  0x85   : > { %s2162_s29 = smov 256   ;;  %s2163_s2 = smov 16  }
  0x86   : > { %1621 = dma.hbm_to_vmem [thread:$0]  (!%p3002_p8), %s2397_s15, 768, %s2399_s12, %s2343_s8, %s2162_s29, %s2162_s29, %s2163_s2  }
  0x87   : > { %p3005_p10 = scmp.ne.s32.totalorder %s2993_s28, 0 }
  0x88   : > { %p3006_p3 = scmp.eq.s32.totalorder (!%p3005_p10), %s2235_s21, 0 }
  0x89   : > { %255 = sbr.rel (%p3005_p10) target bundleno = 842 (0x34a), region = 36 }
  0x90   : > { %2115 = dma.done.wait (%p3006_p3), [#allocation3], 3072   ;;  %p3007_p7 = pmov %p3006_p3 }
  0x91   : > { %p3008_p9 = pmov %p3006_p3 }
  0x92   : > { %2117 = vsyncadd (%p3007_p7), [#allocation3], 4294964224 }
  0x93   : > { %2119 = dma.done.wait (%p3008_p9), [#allocation6], 96   ;;  %p3009_p0 = pmov %p3006_p3 }
  0x94   : > { %s265_s6 = sand.u32 1, %s2235_s21   ;;  %s2437_s8 = sand.u32 1, %s2136_s16  }
  0x95   : > { %2121 = vsyncadd (%p3009_p0), [#allocation6], 4294967200  ;;  %s1446_s28 = sshll.u32 %s2437_s8, 4  ;;  %s266_s9 = scalar_lea.sflag [#allocation3], %s265_s6 }
  0x96   : > { %s269_s15 = scalar_lea.vmem [#allocation7], %s1446_s28  ;;  %p3010_p8 = scmp.ne.s32.totalorder %s2989_s25, 0 }
  0x98   : > { %2123 = dma.done.wait (%p3010_p8), %s266_s9, 1024  }
  0x99   : > { %2125 = vsyncadd (%p3010_p8), %s266_s9, 4294966272  ;;  %v2164_v0 = vmov 0.0   ;;  %v2165_v1 = vmov 32   ;;  %v313_v2 = vld [vmem:[#allocation2 + $0x8] sm:$0xff]  ;;  %v319_v3 = vld [vmem:[#allocation2 + $0x38] sm:$0xff]  ;;  %vm348_vm0 = vcmask 261120   ;;  %v586_v40 = vlaneseq }
  0x9a   : > { %417 = vmatprep.mubr.f32.mxu0 %v2164_v0  ;;  %1703 = vset.pattern.permute.xlu0 %v2165_v1  ;;  %v312_v4 = vld [vmem:[#allocation2] sm:$0xff]  ;;  %v1466_v5 = vpack.c.bf16 %v319_v3, %v313_v2  ;;  %v318_v6 = vld [vmem:[#allocation2 + $0x30] sm:$0xff]  ;;  %v325_v7 = vld [vmem:[#allocation2 + $0x68] sm:$0xff]  ;;  %s2166_s21 = smov 126   ;;  %s2167_s25 = smov 127   ;;  %vm1021_vm1 = vcmask 130048  }
  0x9b   : > { %v331_v8 = vld [vmem:[#allocation2 + $0x98] sm:$0xff]  ;;  %v1468_v9 = vpack.c.bf16 %v318_v6, %v312_v4  ;;  %v324_v11 = vld [vmem:[#allocation2 + $0x60] sm:$0xff]  ;;  %v330_v12 = vld [vmem:[#allocation2 + $0x90] sm:$0xff]  ;;  %v2456_v41 = vshrl.u32 %v586_v40, 7  ;;  %s2168_s11 = smov 111   ;;  %s2169_s12 = smov 112  }
  0x9c   : > { %v1470_v10 = vpack.c.bf16 %v331_v8, %v325_v7  ;;  %v336_v13 = vld [vmem:[%s269_s15] sm:$0xff]  ;;  %1467 = vmatprep.subr.bf16.mxu0 %v1466_v5  ;;  %v1472_v16 = vpack.c.bf16 %v330_v12, %v324_v11  ;;  %v337_v20 = vld [vmem:[%s269_s15 + $0x8] sm:$0xff]  ;;  %s2170_s24 = smov 96   ;;  %s2171_s5 = smov 110   ;;  %vm664_vm2 = vcmask 1039360   ;;  %vm709_vm3 = vcmask 1031168  }
  0x9d   : > { %v315_v14 = vld [vmem:[#allocation2 + $0x18] sm:$0xff]  ;;  %v321_v15 = vld [vmem:[#allocation2 + $0x48] sm:$0xff]  ;;  %340 = vperm.xlu0 %1703, %v336_v13   ;;  %1469 = vmatpush1.bf16.msra.mxu0 %v1468_v9  ;;  %v314_v18 = vld [vmem:[#allocation2 + $0x10] sm:$0xff]  ;;  %v588_v43 = vsub.s32 0, %v2456_v41  ;;  %v592_v46 = vsub.s32 1, %v2456_v41  ;;  %v596_v50 = vsub.s32 2, %v2456_v41 }
  0x9e   : > { %1471 = vmatprep.subr.bf16.mxu0 %v1470_v10  ;;  %v1474_v17 = vpack.c.bf16 %v321_v15, %v315_v14  ;;  %v320_v19 = vld [vmem:[#allocation2 + $0x40] sm:$0xff]  ;;  %v327_v21 = vld [vmem:[#allocation2 + $0x78] sm:$0xff]  ;;  %v333_v22 = vld [vmem:[#allocation2 + $0xa8] sm:$0xff]  ;;  %v600_v58 = vsub.s32 3, %v2456_v41  ;;  %v604_v1 = vsub.s32 4, %v2456_v41  ;;  %s2172_s14 = smov 95  }
  0x9f   : > { %v1476_v23 = vpack.c.bf16 %v320_v19, %v314_v18  ;;  %v1478_v24 = vpack.c.bf16 %v333_v22, %v327_v21  ;;  %v326_v25 = vld [vmem:[#allocation2 + $0x70] sm:$0xff]  ;;  %v332_v26 = vld [vmem:[#allocation2 + $0xa0] sm:$0xff]  ;;  %v317_v27 = vld [vmem:[#allocation2 + $0x28] sm:$0xff]  ;;  %s2173_s10 = smov 94   ;;  %s1591_s22 = smul.u32 48, %s2437_s8  ;;  %vm754_vm4 = vcmask 916480  }
  0xa0   : > { %v323_v28 = vld [vmem:[#allocation2 + $0x58] sm:$0xff]  ;;  %v1480_v29 = vpack.c.bf16 %v332_v26, %v326_v25  ;;  %v316_v31 = vld [vmem:[#allocation2 + $0x20] sm:$0xff]  ;;  %v322_v32 = vld [vmem:[#allocation2 + $0x50] sm:$0xff]  ;;  %vm799_vm5 = vcmask 908288   ;;  %vm844_vm6 = vcmask 900096   ;;  %vm889_vm7 = vcmask 785408  }
  0xa1   : > { %345 = vperm.xlu0 %1703, %v337_v20   ;;  %1473 = vmatpush1.bf16.msra.mxu0 %v1472_v16  ;;  %v1482_v30 = vpack.c.bf16 %v323_v28, %v317_v27  ;;  %v329_v33 = vld [vmem:[#allocation2 + $0x88] sm:$0xff]  ;;  %v335_v34 = vld [vmem:[#allocation2 + $0xb8] sm:$0xff]  ;;  %v1484_v35 = vpack.c.bf16 %v322_v32, %v316_v31  ;;  %v328_v37 = vld [vmem:[#allocation2 + $0x80] sm:$0xff]  ;;  %s2511_s30 = scalar_lea.vmem [#allocation8], %s1591_s22  ;;  %vm934_vm8 = vcmask 777216   ;;  %vm979_vm9 = vcmask 769024  }
  0xa2   : > { %1475 = vmatprep.subr.bf16.mxu0 %v1474_v17  ;;  %v1486_v36 = vpack.c.bf16 %v335_v34, %v329_v33  ;;  %v334_v38 = vld [vmem:[#allocation2 + $0xb0] sm:$0xff]  ;;  %v584_v45 = vld [vmem:[#allocation5] sm:$0x3f]  ;;  %s1592_s23 = smul.u32 120, %s2437_s8  ;;  %s3012_s6 = sld [smem:[#allocation18_spill]] }
  0xa3   : > { %v1488_v39 = vpack.c.bf16 %v334_v38, %v328_v37  ;;  %v589_v49 = vrot.slane %v584_v45, %v588_v43  ;;  %v593_v53 = vrot.slane %v584_v45, %v592_v46  ;;  %v597_v61 = vrot.slane %v584_v45, %v596_v50  ;;  %v2514_v40 = vld [vmem:[%s2511_s30 + $0x8] sm:$0xff]  ;;  %s1631_s13 = smul.u32 1920, %s2144_s18  ;;  %s1290_s18 = scalar_lea.sflag [#allocation4], %s2437_s8 }
  0xa4   : > { %1447 = vmatmul.mubr.msk.f32.vlgmr.msra.gmra.mrb[0].mxu0 %vm348_vm0, %v336_v13  ;;  %v601_v6 = vrot.slane %v584_v45, %v600_v58  ;;  %v605_v11 = vrot.slane %v584_v45, %v604_v1  ;;  %1453 = vmatprep.mubr.msk.f32.mxu1 %vm1021_vm1, %v2514_v40  ;;  %v2546_v43 = vld [vmem:[%s2511_s30 + $0x28] sm:$0xff]  ;;  %s2894_s27 = scalar_lea.vmem [#allocation9], %s1592_s23  ;;  %p3013_p13 = scmp.ne.s32.totalorder %s2990_s26, 0 }
  0xa5   : > { %1477 = vmatpush1.bf16.msra.mxu0 %v1476_v23  ;;  %423 = vmatprep.mubr.f32.mxu0 %v2164_v0  ;;  %s1306_s0 = sshll.u32 %s2894_s27, 4  ;;  %s2176_s15 = smov [#allocation9]   ;;  %s2917_s0 = int_to_ptr.vmem [resolvable:$true] %s1306_s0 }
  0xa6   : > { %1479 = vmatprep.subr.bf16.mxu0 %v1478_v24  ;;  %s2062_s9 = scalar_lea.vmem %s2917_s0, 1920 }
  0xa7   : > { %p2063_p6 = scmp.ne.s32.totalorder %s2917_s0, %s2062_s9 }
  0xa8   : > { %1448 = vmatmul.mubr.msk.f32.gmra.mrb[2].mxu0 %vm348_vm0, %v337_v20  ;;  %s2914_s28 = scalar_lea.hbm %s3012_s6, %s1631_s13 }
  0xa9   : > { %1481 = vmatpush1.bf16.msra.mxu0 %v1480_v29  ;;  %494 = vmatprep.mubr.f32.mxu0 %v2164_v0  ;;  %p2064_p11 = pnand %p2063_p6, %p3013_p13 }
  0xaa   : > { %1483 = vmatprep.subr.bf16.mxu0 %v1482_v30 }
  0xab   : > { %p2065_p4 = pneg %p2064_p11 }
  0xac   : > { %1449 = vmatmul.mubr.msk.f32.vlgmr.msra.gmra.mrb[4].mxu0 %vm348_vm0, %v336_v13 }
  0xad   : > { %1485 = vmatpush1.bf16.msra.mxu0 %v1484_v35  ;;  %500 = vmatprep.mubr.f32.mxu0 %v2164_v0 }
  0xae   : > { %1487 = vmatprep.subr.bf16.mxu0 %v1486_v36 }
  0xb0   : > { %1450 = vmatmul.mubr.msk.f32.gmra.mrb[6].mxu0 %vm348_vm0, %v337_v20 }
  0xb1   : > { %1489 = vmatpush1.bf16.msra.mxu0 %v1488_v39  ;;  %571 = vmatprep.mubr.f32.mxu0 %v2164_v0 }
  0xb4   : > { %1451 = vmatmul.mubr.msk.f32.vlgmr.msra.gmra.mrb[8].mxu0 %vm348_vm0, %v336_v13 }
  0xb5   : > { %577 = vmatprep.mubr.f32.mxu0 %v2164_v0 }
  0xb8   : > { %1452 = vmatmul.mubr.msk.f32.gmra.mrb[10].mxu0 %vm348_vm0, %v337_v20  ;;  %v608_v20 = vsub.s32 5, %v2456_v41  ;;  %v2541_v41 = vld [vmem:[%s2511_s30 + $0x18] sm:$0xff] }
  0xb9   : > { %1456 = vmatprep.mubr.msk.f32.mxu0 %vm1021_vm1, %v2514_v40 }
  0xba   : > { %v609_v28 = vrot.slane %v584_v45, %v608_v20 }
 0x11c   : > { %v341_v42 = vpop.permute.xlu0 %340 }
 0x120   : > { %v346_v51 = vpop.permute.xlu0 %345 }
 0x177   : > { %v419_v44 = vpop.f32.mrb[0].mxu0 }
 0x178   : > { %v421_v47 = vpop.f32.mrb[1].mxu0  ;;  %v420_v48 = vadd.f32 %v419_v44, %v341_v42 }
 0x179   : > { %v422_v52 = vadd.f32 %v421_v47, %v341_v42 }
 0x17a   : > { %v616_v59 = vmul.f32 %v589_v49, %v420_v48 }
 0x17b   : > { %v425_v54 = vpop.f32.mrb[2].mxu0  ;;  %v617_v62 = vmul.f32 %v593_v53, %v422_v52 }
 0x17c   : > { %v426_v55 = vadd.f32 %v425_v54, %v346_v51  ;;  %v427_v56 = vpop.f32.mrb[3].mxu0 }
 0x17d   : > { %v428_v57 = vadd.f32 %v427_v56, %v346_v51 }
 0x17e   : > { %v622_v60 = vmul.f32 %v589_v49, %v426_v55 }
 0x17f   : > { %v623_v63 = vmul.f32 %v593_v53, %v428_v57  ;;  %v496_v0 = vpop.f32.mrb[4].mxu0 }
 0x180   : > { %v497_v2 = vadd.f32 %v496_v0, %v341_v42  ;;  %v498_v3 = vpop.f32.mrb[5].mxu0  ;;  %v2463_v4 = vpack.i.bf16 %v622_v60, %v616_v59  ;;  %v1492_v5 = vpack.c.bf16 %v622_v60, %v616_v59 }
 0x181   : > { %v1490_v7 = vpack.c.bf16 %v623_v63, %v617_v62  ;;  %v499_v9 = vadd.f32 %v498_v3, %v341_v42 }
 0x182   : > { %v618_v8 = vmul.f32 %v597_v61, %v497_v2  ;;  %1710 = vrot.lane.b32.xlu1 %v2463_v4, %s2166_s21  ;;  %1705 = vrot.lane.b32.xlu0 %v2463_v4, %s2167_s25 }
 0x183   : > { %v502_v10 = vpop.f32.mrb[6].mxu0  ;;  %1491 = vmatprep.subr.bf16.mxu1 %v1490_v7  ;;  %v619_v17 = vmul.f32 %v601_v6, %v499_v9 }
 0x184   : > { %v503_v12 = vadd.f32 %v502_v10, %v346_v51  ;;  %v504_v13 = vpop.f32.mrb[7].mxu0  ;;  %1493 = vmatpush1.bf16.msra.mxu1 %v1492_v5  ;;  %v1739_v14 = vpack.i.bf16 %v618_v8, %v617_v62 }
 0x185   : > { %v505_v15 = vadd.f32 %v504_v13, %v346_v51 }
 0x186   : > { %v624_v16 = vmul.f32 %v597_v61, %v503_v12  ;;  %1720 = vrot.lane.b32.xlu1 %v2463_v4, %s2168_s11  ;;  %1715 = vrot.lane.b32.xlu0 %v2463_v4, %s2169_s12 }
 0x187   : > { %v625_v18 = vmul.f32 %v601_v6, %v505_v15  ;;  %v573_v19 = vpop.f32.mrb[8].mxu0 }
 0x188   : > { %v574_v21 = vadd.f32 %v573_v19, %v341_v42  ;;  %v575_v22 = vpop.f32.mrb[9].mxu0  ;;  %v1528_v23 = vpack.c.bf16 %v624_v16, %v618_v8  ;;  %v1774_v24 = vpack.i.bf16 %v624_v16, %v623_v63 }
 0x189   : > { %v576_v25 = vadd.f32 %v575_v22, %v341_v42  ;;  %v1526_v26 = vpack.c.bf16 %v625_v18, %v619_v17  ;;  %v2174_v42 = vmov 16  }
 0x18a   : > { %v2474_v27 = vmul.f32 %v605_v11, %v574_v21  ;;  %1730 = vrot.lane.b32.xlu1 %v2463_v4, %s2170_s24  ;;  %1725 = vrot.lane.b32.xlu0 %v2463_v4, %s2171_s5 }
 0x18b   : > { %v579_v29 = vpop.f32.mrb[10].mxu0  ;;  %1527 = vmatprep.subr.bf16.mxu0 %v1526_v26  ;;  %v621_v35 = vmul.f32 %v609_v28, %v576_v25  ;;  %1944 = vset.pattern.permute.xlu0 %v2174_v42 }
 0x18c   : > { %v580_v30 = vadd.f32 %v579_v29, %v346_v51  ;;  %v581_v31 = vpop.f32.mrb[11].mxu0  ;;  %1529 = vmatpush1.bf16.msra.mxu0 %v1528_v23  ;;  %v1824_v32 = vpack.i.bf16 %v2474_v27, %v619_v17  ;;  %1945 = vset.pattern.permute.xlu1 %v2174_v42 }
 0x18d   : > { %v582_v33 = vadd.f32 %v581_v31, %v346_v51 }
 0x18e   : > { %v2481_v34 = vmul.f32 %v605_v11, %v580_v30  ;;  %1740 = vrot.lane.b32.xlu1 %v1739_v14, %s2167_s25  ;;  %1735 = vrot.lane.b32.xlu0 %v2463_v4, %s2172_s14 }
 0x18f   : > { %v627_v36 = vmul.f32 %v609_v28, %v582_v33 }
 0x190   : > { %v1849_v37 = vpack.i.bf16 %v2481_v34, %v625_v18  ;;  %v1563_v39 = vpack.c.bf16 %v2481_v34, %v2474_v27 }
 0x191   : > { %v1864_v38 = vpack.i.bf16 %v627_v36, %v621_v35 }
 0x192   : > { %1745 = vrot.lane.b32.xlu1 %v1739_v14, %s2166_s21  ;;  %1750 = vrot.lane.b32.xlu0 %v1739_v14, %s2169_s12 }
 0x196   : > { %1755 = vrot.lane.b32.xlu1 %v1739_v14, %s2168_s11  ;;  %1760 = vrot.lane.b32.xlu0 %v1739_v14, %s2171_s5 }
 0x19a   : > { %1765 = vrot.lane.b32.xlu1 %v1739_v14, %s2170_s24  ;;  %1770 = vrot.lane.b32.xlu0 %v1739_v14, %s2172_s14 }
 0x19e   : > { %1775 = vrot.lane.b32.xlu1 %v1774_v24, %s2167_s25  ;;  %1785 = vrot.lane.b32.xlu0 %v1774_v24, %s2166_s21 }
 0x1a2   : > { %1780 = vrot.lane.b32.xlu1 %v1739_v14, %s2173_s10  ;;  %1800 = vrot.lane.b32.xlu0 %v1774_v24, %s2168_s11 }
 0x1a6   : > { %1790 = vrot.lane.b32.xlu1 %v1774_v24, %s2169_s12  ;;  %1810 = vrot.lane.b32.xlu0 %v1774_v24, %s2170_s24 }
 0x1aa   : > { %1795 = vrot.lane.b32.xlu1 %v2463_v4, %s2173_s10  ;;  %1820 = vrot.lane.b32.xlu0 %v1774_v24, %s2173_s10 }
 0x1ae   : > { %1805 = vrot.lane.b32.xlu1 %v1774_v24, %s2171_s5  ;;  %1825 = vrot.lane.b32.xlu0 %v1824_v32, %s2167_s25 }
 0x1b2   : > { %1815 = vrot.lane.b32.xlu1 %v1774_v24, %s2172_s14  ;;  %1835 = vrot.lane.b32.xlu0 %v1824_v32, %s2169_s12 }
 0x1b6   : > { %1830 = vrot.lane.b32.xlu1 %v1824_v32, %s2166_s21  ;;  %1850 = vrot.lane.b32.xlu0 %v1849_v37, %s2166_s21 }
 0x1ba   : > { %1840 = vrot.lane.b32.xlu1 %v1824_v32, %s2168_s11  ;;  %1860 = vrot.lane.b32.xlu0 %v1849_v37, %s2168_s11 }
 0x1be   : > { %1845 = vrot.lane.b32.xlu1 %v1849_v37, %s2167_s25  ;;  %1865 = vrot.lane.b32.xlu0 %v1864_v38, %s2167_s25 }
 0x1c2   : > { %1855 = vrot.lane.b32.xlu1 %v1849_v37, %s2169_s12  ;;  %1870 = vrot.lane.b32.xlu0 %v1824_v32, %s2171_s5 }
 0x1c6   : > { %1875 = vrot.lane.b32.xlu1 %v1849_v37, %s2171_s5  ;;  %1890 = vrot.lane.b32.xlu0 %v1864_v38, %s2169_s12 }
 0x1ca   : > { %1880 = vrot.lane.b32.xlu1 %v1864_v38, %s2166_s21  ;;  %1895 = vrot.lane.b32.xlu0 %v1849_v37, %s2170_s24  ;;  %s2066_s21 = sshll.u32 %s2176_s15, 4  ;;  %s2067_s21 = int_to_ptr.vmem [resolvable:$false] %s2066_s21 }
 0x1cb   : > { %s2068_s25 = scalar_lea.vmem %s2067_s21, 3840  ;;  %p2069_p12 = scmp.lt.s32.totalorder %s2917_s0, %s2067_s21 }
 0x1cc   : > { %p2070_p1 = scmp.lt.s32.totalorder %s2068_s25, %s2062_s9 }
 0x1ce   : > { %1885 = vrot.lane.b32.xlu1 %v1824_v32, %s2170_s24  ;;  %1905 = vrot.lane.b32.xlu0 %v1864_v38, %s2171_s5  ;;  %p2071_p2 = por %p2070_p1, %p2069_p12 }
 0x1d0   : > { %p2072_p5 = pnand %p2071_p2, %p2065_p4 }
 0x1d2   : > { %1900 = vrot.lane.b32.xlu1 %v1864_v38, %s2168_s11  ;;  %1910 = vrot.lane.b32.xlu0 %v1824_v32, %s2172_s14 }
 0x1d6   : > { %1915 = vrot.lane.b32.xlu1 %v1849_v37, %s2172_s14  ;;  %1930 = vrot.lane.b32.xlu0 %v1864_v38, %s2172_s14 }
 0x1da   : > { %1920 = vrot.lane.b32.xlu1 %v1864_v38, %s2170_s24  ;;  %1935 = vrot.lane.b32.xlu0 %v1849_v37, %s2173_s10 }
 0x1de   : > { %1925 = vrot.lane.b32.xlu1 %v1824_v32, %s2173_s10  ;;  %1008 = vperm.xlu0 %1944, %v2514_v40  }
 0x1e2   : > { %1940 = vrot.lane.b32.xlu1 %v1864_v38, %s2173_s10 }
 0x1e6   : > { %1013 = vperm.xlu1 %1945, %v2541_v41  }
 0x1ea   : > { %1018 = vperm.xlu1 %1945, %v2546_v43  }
 0x1f4   : > { %v1711_v44 = vpop.permute.xlu1 %1710  ;;  %v1706_v45 = vpop.permute.xlu0 %1705 }
 0x1f5   : > { %v1708_v60 = vunpack.i.h.bf16 %v1706_v45  ;;  %v1707_v61 = vunpack.i.l.bf16 %v1706_v45  ;;  %v1713_v11 = vunpack.i.h.bf16 %v1711_v44  ;;  %v1712_v16 = vunpack.i.l.bf16 %v1711_v44 }
 0x1f8   : > { %v2549_v46 = vpop.permute.xlu1 %1720  ;;  %v2551_v47 = vpop.permute.xlu0 %1715 }
 0x1f9   : > { %v1718_v24 = vunpack.i.h.bf16 %v2551_v47  ;;  %v1717_v25 = vunpack.i.l.bf16 %v2551_v47  ;;  %v1723_v45 = vunpack.i.h.bf16 %v2549_v46 }
 0x1fc   : > { %v2553_v48 = vpop.permute.xlu1 %1730  ;;  %v2555_v49 = vpop.permute.xlu0 %1725 }
 0x200   : > { %v2557_v50 = vpop.permute.xlu1 %1740  ;;  %v2559_v51 = vpop.permute.xlu0 %1735 }
 0x201   : > { %v1743_v58 = vunpack.i.h.bf16 %v2557_v50  ;;  %v1742_v59 = vunpack.i.l.bf16 %v2557_v50 }
 0x203   : > { %v666_v6 = vsel %vm664_vm2, %v1742_v59, %v1743_v58  ;;  %v665_v8 = vsel %vm664_vm2, %v1707_v61, %v1742_v59 }
 0x204   : > { %v2561_v52 = vpop.permute.xlu1 %1745  ;;  %v2563_v53 = vpop.permute.xlu0 %1750 }
 0x205   : > { %v1748_v62 = vunpack.i.h.bf16 %v2561_v52  ;;  %v1747_v63 = vunpack.i.l.bf16 %v2561_v52  ;;  %v1753_v18 = vunpack.i.h.bf16 %v2563_v53  ;;  %v1752_v19 = vunpack.i.l.bf16 %v2563_v53 }
 0x207   : > { %v711_v17 = vsel %vm709_vm3, %v1747_v63, %v1748_v62  ;;  %v710_v30 = vsel %vm709_vm3, %v1712_v16, %v1747_v63  ;;  %v756_v36 = vsel %vm754_vm4, %v1752_v19, %v1753_v18  ;;  %v755_v38 = vsel %vm754_vm4, %v1717_v25, %v1752_v19 }
 0x208   : > { %v2565_v54 = vpop.permute.xlu1 %1755  ;;  %v2567_v55 = vpop.permute.xlu0 %1760  ;;  %v1722_v63 = vunpack.i.l.bf16 %v2549_v46  ;;  %v1728_v46 = vunpack.i.h.bf16 %v2555_v49 }
 0x209   : > { %v1758_v26 = vunpack.i.h.bf16 %v2565_v54  ;;  %v1757_v31 = vunpack.i.l.bf16 %v2565_v54 }
 0x20c   : > { %v2569_v56 = vpop.permute.xlu1 %1765  ;;  %v2571_v57 = vpop.permute.xlu0 %1770 }
 0x20d   : > { %v1767_v19 = vunpack.i.l.bf16 %v2569_v56 }
 0x210   : > { %v2577_v0 = vpop.permute.xlu1 %1775  ;;  %v2579_v1 = vpop.permute.xlu0 %1785 }
 0x211   : > { %v1778_v2 = vunpack.i.h.bf16 %v2577_v0  ;;  %v1777_v3 = vunpack.i.l.bf16 %v2577_v0  ;;  %v1788_v4 = vunpack.i.h.bf16 %v2579_v1  ;;  %v1787_v5 = vunpack.i.l.bf16 %v2579_v1 }
 0x213   : > { %v671_v7 = vsel %vm664_vm2, %v1777_v3, %v1778_v2  ;;  %v670_v9 = vsel %vm664_vm2, %v1708_v60, %v1777_v3  ;;  %v716_v10 = vsel %vm709_vm3, %v1787_v5, %v1788_v4  ;;  %v715_v21 = vsel %vm709_vm3, %v1713_v11, %v1787_v5 }
 0x214   : > { %v2596_v12 = vpop.permute.xlu1 %1780  ;;  %v2598_v13 = vpop.permute.xlu0 %1800  ;;  %v1494_v14 = vpack.c.bf16 %v671_v7, %v666_v6  ;;  %v1496_v15 = vpack.c.bf16 %v670_v9, %v665_v8  ;;  %v1498_v20 = vpack.c.bf16 %v716_v10, %v711_v17  ;;  %v1500_v35 = vpack.c.bf16 %v715_v21, %v710_v30 }
 0x215   : > { %v1803_v22 = vunpack.i.h.bf16 %v2598_v13  ;;  %v1802_v23 = vunpack.i.l.bf16 %v2598_v13  ;;  %v801_v3 = vsel %vm799_vm5, %v1757_v31, %v1758_v26  ;;  %v1763_v5 = vunpack.i.h.bf16 %v2567_v55 }
 0x216   : > { %1495 = vmatprep.subr.bf16.mxu1 %v1494_v14  ;;  %v1762_v6 = vunpack.i.l.bf16 %v2567_v55  ;;  %v1727_v11 = vunpack.i.l.bf16 %v2555_v49  ;;  %v1768_v14 = vunpack.i.h.bf16 %v2569_v56  ;;  %v800_v17 = vsel %vm799_vm5, %v1722_v63, %v1757_v31 }
 0x217   : > { %1497 = vmatpush1.bf16.msra.mxu1 %v1496_v15  ;;  %v806_v44 = vsel %vm799_vm5, %v1802_v23, %v1803_v22  ;;  %v805_v8 = vsel %vm799_vm5, %v1723_v45, %v1802_v23  ;;  %v1772_v45 = vunpack.i.l.bf16 %v2571_v57 }
 0x218   : > { %v2611_v28 = vpop.permute.xlu1 %1790  ;;  %v2613_v29 = vpop.permute.xlu0 %1810  ;;  %1499 = vmatprep.subr.bf16.mxu1 %v1498_v20  ;;  %v1506_v7 = vpack.c.bf16 %v806_v44, %v801_v3  ;;  %v1508_v23 = vpack.c.bf16 %v805_v8, %v800_v17  ;;  %v846_v49 = vsel %vm844_vm6, %v1762_v6, %v1763_v5  ;;  %v845_v30 = vsel %vm844_vm6, %v1727_v11, %v1762_v6 }
 0x219   : > { %v1793_v32 = vunpack.i.h.bf16 %v2611_v28  ;;  %v1792_v33 = vunpack.i.l.bf16 %v2611_v28  ;;  %v1813_v9 = vunpack.i.h.bf16 %v2613_v29  ;;  %v1812_v10 = vunpack.i.l.bf16 %v2613_v29 }
 0x21a   : > { %v891_v63 = vsel %vm889_vm7, %v1767_v19, %v1768_v14  ;;  %v2983_v3 = vunpack.i.h.bf16 %v2596_v12  ;;  %v1782_v8 = vunpack.i.l.bf16 %v2596_v12 }
 0x21b   : > { %1501 = vmatpush1.bf16.msra.mxu1 %v1500_v35  ;;  %v761_v37 = vsel %vm754_vm4, %v1792_v33, %v1793_v32  ;;  %v760_v42 = vsel %vm754_vm4, %v1718_v24, %v1792_v33  ;;  %v1733_v24 = vunpack.i.h.bf16 %v2553_v48  ;;  %v896_v33 = vsel %vm889_vm7, %v1812_v10, %v1813_v9 }
 0x21c   : > { %v2631_v47 = vpop.permute.xlu1 %1795  ;;  %v2633_v59 = vpop.permute.xlu0 %1820  ;;  %v1502_v60 = vpack.c.bf16 %v761_v37, %v756_v36  ;;  %v1504_v61 = vpack.c.bf16 %v760_v42, %v755_v38  ;;  %v1732_v35 = vunpack.i.l.bf16 %v2553_v48  ;;  %v1773_v36 = vunpack.i.h.bf16 %v2571_v57 }
 0x21d   : > { %v1738_v48 = vunpack.i.h.bf16 %v2559_v51  ;;  %v1514_v6 = vpack.c.bf16 %v896_v33, %v891_v63  ;;  %v1822_v11 = vunpack.i.l.bf16 %v2633_v59 }
 0x21e   : > { %1503 = vmatprep.subr.bf16.mxu1 %v1502_v60 }
 0x21f   : > { %1505 = vmatpush1.bf16.msra.mxu1 %v1504_v61 }
 0x220   : > { %v2647_v15 = vpop.permute.xlu1 %1805  ;;  %v2649_v16 = vpop.permute.xlu0 %1825  ;;  %1507 = vmatprep.subr.bf16.mxu1 %v1506_v7  ;;  %v895_v7 = vsel %vm889_vm7, %v1733_v24, %v1812_v10  ;;  %v890_v10 = vsel %vm889_vm7, %v1732_v35, %v1767_v19  ;;  %v1737_v24 = vunpack.i.l.bf16 %v2559_v51 }
 0x221   : > { %v1808_v20 = vunpack.i.h.bf16 %v2647_v15  ;;  %v1807_v21 = vunpack.i.l.bf16 %v2647_v15  ;;  %v1827_v51 = vunpack.i.l.bf16 %v2649_v16 }
 0x223   : > { %1509 = vmatpush1.bf16.msra.mxu1 %v1508_v23  ;;  %v851_v25 = vsel %vm844_vm6, %v1807_v21, %v1808_v20  ;;  %v850_v31 = vsel %vm844_vm6, %v1728_v46, %v1807_v21  ;;  %v1823_v46 = vunpack.i.h.bf16 %v2633_v59  ;;  %v1798_v21 = vunpack.i.h.bf16 %v2631_v47 }
 0x224   : > { %v2669_v37 = vpop.permute.xlu1 %1815  ;;  %v2671_v38 = vpop.permute.xlu0 %1835  ;;  %v1510_v42 = vpack.c.bf16 %v851_v25, %v846_v49  ;;  %v1512_v44 = vpack.c.bf16 %v850_v31, %v845_v30  ;;  %v1797_v23 = vunpack.i.l.bf16 %v2631_v47  ;;  %v1516_v30 = vpack.c.bf16 %v895_v7, %v890_v10 }
 0x225   : > { %v1818_v60 = vunpack.i.h.bf16 %v2669_v37  ;;  %v1817_v61 = vunpack.i.l.bf16 %v2669_v37  ;;  %v936_v31 = vsel %vm934_vm8, %v1772_v45, %v1773_v36  ;;  %v935_v47 = vsel %vm934_vm8, %v1737_v24, %v1772_v45 }
 0x226   : > { %1511 = vmatprep.subr.bf16.mxu1 %v1510_v42  ;;  %v986_v19 = vsel %vm979_vm9, %v1822_v11, %v1823_v46  ;;  %v985_v45 = vsel %vm979_vm9, %v1798_v21, %v1822_v11  ;;  %v1828_v24 = vunpack.i.h.bf16 %v2649_v16 }
 0x227   : > { %1513 = vmatpush1.bf16.msra.mxu1 %v1512_v44  ;;  %v941_v17 = vsel %vm934_vm8, %v1817_v61, %v1818_v60  ;;  %v940_v33 = vsel %vm934_vm8, %v1738_v48, %v1817_v61  ;;  %v981_v44 = vsel %vm979_vm9, %v1782_v8, %v2983_v3  ;;  %v980_v48 = vsel %vm979_vm9, %v1797_v23, %v1782_v8 }
 0x228   : > { %v2690_v49 = vpop.permute.xlu1 %1830  ;;  %v2692_v25 = vpop.permute.xlu0 %1850  ;;  %1515 = vmatprep.subr.bf16.mxu1 %v1514_v6  ;;  %v1518_v42 = vpack.c.bf16 %v941_v17, %v936_v31  ;;  %v1520_v61 = vpack.c.bf16 %v940_v33, %v935_v47  ;;  %v667_v31 = vsel %vm664_vm2, %v1743_v58, %v1827_v51  ;;  %v1524_v11 = vpack.c.bf16 %v985_v45, %v980_v48 }
 0x229   : > { %v1833_v6 = vunpack.i.h.bf16 %v2690_v49  ;;  %v1832_v7 = vunpack.i.l.bf16 %v2690_v49  ;;  %v1853_v17 = vunpack.i.h.bf16 %v2692_v25  ;;  %v1852_v10 = vunpack.i.l.bf16 %v2692_v25 }
 0x22a   : > { %v1838_v47 = vunpack.i.h.bf16 %v2671_v38  ;;  %v668_v58 = vsel %vm664_vm2, %v1827_v51, %v1828_v24 }
 0x22b   : > { %1517 = vmatpush1.bf16.msra.mxu1 %v1516_v30  ;;  %v1522_v30 = vpack.c.bf16 %v986_v19, %v981_v44  ;;  %v718_v16 = vsel %vm709_vm3, %v1852_v10, %v1853_v17  ;;  %v1837_v19 = vunpack.i.l.bf16 %v2671_v38 }
 0x22c   : > { %v2708_v35 = vpop.permute.xlu1 %1840  ;;  %v2710_v63 = vpop.permute.xlu0 %1860  ;;  %1519 = vmatprep.subr.bf16.mxu1 %v1518_v42  ;;  %v713_v42 = vsel %vm709_vm3, %v1832_v7, %v1833_v6 }
 0x22d   : > { %v1534_v0 = vpack.c.bf16 %v718_v16, %v713_v42  ;;  %v2763_v16 = vld [vmem:[%s2511_s30 + $0x10] sm:$0xff] }
 0x22f   : > { %1521 = vmatpush1.bf16.msra.mxu1 %v1520_v61  ;;  %v712_v61 = vsel %vm709_vm3, %v1748_v62, %v1832_v7  ;;  %v2175_v62 = vmov 0.0|0.0   ;;  %v1862_v7 = vunpack.i.l.bf16 %v2710_v63 }
 0x230   : > { %v1846_v33 = vpop.permute.xlu1 %1845  ;;  %v1866_v8 = vpop.permute.xlu0 %1865  ;;  %1523 = vmatprep.subr.bf16.mxu1 %v1522_v30  ;;  %v2739_v30 = vld [vmem:[%s2511_s30] sm:$0xff] }
 0x231   : > { %v1848_v21 = vunpack.i.h.bf16 %v1846_v33  ;;  %v1847_v23 = vunpack.i.l.bf16 %v1846_v33  ;;  %v1868_v50 = vunpack.i.h.bf16 %v1866_v8  ;;  %v1867_v44 = vunpack.i.l.bf16 %v1866_v8 }
 0x232   : > { %v717_v33 = vsel %vm709_vm3, %v1788_v4, %v1852_v10  ;;  %v1843_v4 = vunpack.i.h.bf16 %v2708_v35  ;;  %v1863_v10 = vunpack.i.h.bf16 %v2710_v63  ;;  %v807_v34 = vsel %vm799_vm5, %v1803_v22, %v1862_v7 }
 0x233   : > { %v672_v48 = vsel %vm664_vm2, %v1778_v2, %v1847_v23  ;;  %1525 = vmatpush1.bf16.msra.mxu1 %v1524_v11  ;;  %v673_v45 = vsel %vm664_vm2, %v1847_v23, %v1848_v21  ;;  %v1842_v2 = vunpack.i.l.bf16 %v2708_v35  ;;  %v669_v23 = vsel %vm664_vm2, %v1828_v24, %v1867_v44 }
 0x234   : > { %v1532_v51 = vpack.c.bf16 %v672_v48, %v667_v31  ;;  %v2744_v8 = vpop.permute.xlu1 %1855  ;;  %v2746_v3 = vpop.permute.xlu0 %1870  ;;  %v1530_v52 = vpack.c.bf16 %v673_v45, %v668_v58  ;;  %1562 = vmatprep.subr.bf16.mxu1 %v2175_v62  ;;  %v674_v31 = vsel %vm664_vm2, %v1848_v21, %v1868_v50  ;;  %v758_v24 = vsel %vm754_vm4, %v1837_v19, %v1838_v47 }
 0x235   : > { %v1858_v11 = vunpack.i.h.bf16 %v2744_v8  ;;  %v1857_v1 = vunpack.i.l.bf16 %v2744_v8  ;;  %v1536_v21 = vpack.c.bf16 %v717_v33, %v712_v61  ;;  %v802_v27 = vsel %vm799_vm5, %v1758_v26, %v1842_v2 }
 0x236   : > { %1531 = vmatprep.subr.bf16.mxu0 %v1530_v52  ;;  %1093 = vmatmul.mubr.f32.vlgmr.msra.gmra.mrb[0].mxu1 %v2739_v30  ;;  %v803_v54 = vsel %vm799_vm5, %v1842_v2, %v1843_v4  ;;  %v808_v26 = vsel %vm799_vm5, %v1862_v7, %v1863_v10  ;;  %v1873_v13 = vunpack.i.h.bf16 %v2746_v3  ;;  %v1872_v22 = vunpack.i.l.bf16 %v2746_v3 }
 0x237   : > { %1533 = vmatpush1.bf16.msra.mxu0 %v1532_v51  ;;  %1564 = vmatpush1.bf16.msra.mxu1 %v1563_v39  ;;  %v763_v42 = vsel %vm754_vm4, %v1857_v1, %v1858_v11  ;;  %v1566_v39 = vpack.c.bf16 %v674_v31, %v669_v23  ;;  %v762_v50 = vsel %vm754_vm4, %v1793_v32, %v1857_v1  ;;  %v2794_v32 = vld [vmem:[%s2511_s30 + $0x20] sm:$0xff] }
 0x238   : > { %v2765_v58 = vpop.permute.xlu1 %1875  ;;  %v1891_v48 = vpop.permute.xlu0 %1890  ;;  %1535 = vmatprep.subr.bf16.mxu0 %v1534_v0  ;;  %1565 = vmatprep.subr.bf16.mxu1 %v2175_v62  ;;  %v1538_v44 = vpack.c.bf16 %v763_v42, %v758_v24  ;;  %v757_v45 = vsel %vm754_vm4, %v1753_v18, %v1837_v19  ;;  %v1544_v1 = vpack.c.bf16 %v807_v34, %v802_v27 }
 0x239   : > { %1454 = vmatprep.mubr.msk.f32.mxu1 %vm1021_vm1, %v2541_v41  ;;  %v1878_v61 = vunpack.i.h.bf16 %v2765_v58  ;;  %v1877_v28 = vunpack.i.l.bf16 %v2765_v58  ;;  %v1893_v33 = vunpack.i.h.bf16 %v1891_v48  ;;  %v1892_v51 = vunpack.i.l.bf16 %v1891_v48 }
 0x23a   : > { %1099 = vmatmul.mubr.f32.gmra.mrb[2].mxu1 %v2763_v16  ;;  %v1540_v0 = vpack.c.bf16 %v762_v50, %v757_v45  ;;  %v1542_v31 = vpack.c.bf16 %v808_v26, %v803_v54  ;;  %v848_v19 = vsel %vm844_vm6, %v1872_v22, %v1873_v13 }
 0x23b   : > { %1537 = vmatpush1.bf16.msra.mxu0 %v1536_v21  ;;  %1567 = vmatpush1.bf16.msra.mxu1 %v1566_v39  ;;  %v853_v23 = vsel %vm844_vm6, %v1877_v28, %v1878_v61  ;;  %v764_v42 = vsel %vm754_vm4, %v1858_v11, %v1893_v33  ;;  %v759_v58 = vsel %vm754_vm4, %v1838_v47, %v1892_v51 }
 0x23c   : > { %v1881_v8 = vpop.permute.xlu1 %1880  ;;  %v2799_v52 = vpop.permute.xlu0 %1895  ;;  %1539 = vmatprep.subr.bf16.mxu0 %v1538_v44  ;;  %1568 = vmatprep.subr.bf16.mxu1 %v2175_v62  ;;  %v852_v38 = vsel %vm844_vm6, %v1808_v20, %v1877_v28  ;;  %v1546_v47 = vpack.c.bf16 %v853_v23, %v848_v19  ;;  %v1572_v27 = vpack.c.bf16 %v764_v42, %v759_v58 }
 0x23d   : > { %v1883_v2 = vunpack.i.h.bf16 %v1881_v8  ;;  %v1882_v7 = vunpack.i.l.bf16 %v1881_v8  ;;  %1455 = vmatprep.mubr.msk.f32.mxu1 %vm1021_vm1, %v2546_v43  ;;  %v1898_v25 = vunpack.i.h.bf16 %v2799_v52 }
 0x23e   : > { %1105 = vmatmul.mubr.f32.gmra.mrb[4].mxu1 %v2794_v32 }
 0x23f   : > { %v714_v53 = vsel %vm709_vm3, %v1833_v6, %v1882_v7  ;;  %v719_v18 = vsel %vm709_vm3, %v1853_v17, %v1883_v2  ;;  %1541 = vmatpush1.bf16.msra.mxu0 %v1540_v0  ;;  %1459 = vmatprep.mubr.msk.f32.mxu1 %vm1021_vm1, %v2514_v40  ;;  %v1897_v17 = vunpack.i.l.bf16 %v2799_v52  ;;  %v847_v40 = vsel %vm844_vm6, %v1763_v5, %v1872_v22 }
 0x240   : > { %v1569_v49 = vpack.c.bf16 %v719_v18, %v714_v53  ;;  %v2819_v48 = vpop.permute.xlu1 %1885  ;;  %v1906_v6 = vpop.permute.xlu0 %1905  ;;  %1543 = vmatprep.subr.bf16.mxu0 %v1542_v31  ;;  %v1548_v15 = vpack.c.bf16 %v852_v38, %v847_v40 }
 0x241   : > { %v1888_v24 = vunpack.i.h.bf16 %v2819_v48  ;;  %v1887_v11 = vunpack.i.l.bf16 %v2819_v48  ;;  %v1908_v21 = vunpack.i.h.bf16 %v1906_v6  ;;  %v1907_v34 = vunpack.i.l.bf16 %v1906_v6 }
 0x242   : > { %1570 = vmatpush1.bf16.msra.mxu1 %v1569_v49  ;;  %v898_v26 = vsel %vm889_vm7, %v1897_v17, %v1898_v25  ;;  %v897_v28 = vsel %vm889_vm7, %v1813_v9, %v1897_v17 }
 0x243   : > { %1545 = vmatpush1.bf16.msra.mxu0 %v1544_v1  ;;  %1571 = vmatprep.subr.bf16.mxu1 %v2175_v62  ;;  %v893_v44 = vsel %vm889_vm7, %v1887_v11, %v1888_v24  ;;  %v892_v55 = vsel %vm889_vm7, %v1768_v14, %v1887_v11  ;;  %v854_v22 = vsel %vm844_vm6, %v1878_v61, %v1908_v21 }
 0x244   : > { %v1901_v39 = vpop.permute.xlu1 %1900  ;;  %v1911_v50 = vpop.permute.xlu0 %1910  ;;  %1547 = vmatprep.subr.bf16.mxu0 %v1546_v47  ;;  %v1550_v5 = vpack.c.bf16 %v898_v26, %v893_v44  ;;  %v849_v56 = vsel %vm844_vm6, %v1873_v13, %v1907_v34  ;;  %v1552_v35 = vpack.c.bf16 %v897_v28, %v892_v55 }
 0x245   : > { %v1903_v54 = vunpack.i.h.bf16 %v1901_v39  ;;  %v1902_v20 = vunpack.i.l.bf16 %v1901_v39  ;;  %v1913_v9 = vunpack.i.h.bf16 %v1911_v50  ;;  %v1912_v14 = vunpack.i.l.bf16 %v1911_v50 }
 0x246   : > { %1573 = vmatpush1.bf16.msra.mxu1 %v1572_v27  ;;  %v1578_v63 = vpack.c.bf16 %v854_v22, %v849_v56 }
 0x247   : > { %v804_v45 = vsel %vm799_vm5, %v1843_v4, %v1902_v20  ;;  %v809_v33 = vsel %vm799_vm5, %v1863_v10, %v1903_v54  ;;  %1549 = vmatpush1.bf16.msra.mxu0 %v1548_v15  ;;  %1574 = vmatprep.subr.bf16.mxu1 %v2175_v62  ;;  %v937_v3 = vsel %vm934_vm8, %v1773_v36, %v1912_v14 }
 0x248   : > { %v1575_v29 = vpack.c.bf16 %v809_v33, %v804_v45  ;;  %v1916_v51 = vpop.permute.xlu1 %1915  ;;  %v1931_v61 = vpop.permute.xlu0 %1930  ;;  %1551 = vmatprep.subr.bf16.mxu0 %v1550_v5  ;;  %v938_v2 = vsel %vm934_vm8, %v1912_v14, %v1913_v9 }
 0x249   : > { %v1918_v8 = vunpack.i.h.bf16 %v1916_v51  ;;  %v1917_v4 = vunpack.i.l.bf16 %v1916_v51  ;;  %v1933_v13 = vunpack.i.h.bf16 %v1931_v61  ;;  %v1932_v31 = vunpack.i.l.bf16 %v1931_v61 }
 0x24a   : > { %1576 = vmatpush1.bf16.msra.mxu1 %v1575_v29 }
 0x24b   : > { %v942_v10 = vsel %vm934_vm8, %v1818_v60, %v1917_v4  ;;  %1553 = vmatpush1.bf16.msra.mxu0 %v1552_v35  ;;  %1577 = vmatprep.subr.bf16.mxu1 %v2175_v62  ;;  %v943_v7 = vsel %vm934_vm8, %v1917_v4, %v1918_v8  ;;  %v944_v58 = vsel %vm934_vm8, %v1918_v8, %v1933_v13 }
 0x24c   : > { %v1921_v52 = vpop.permute.xlu1 %1920  ;;  %v1936_v0 = vpop.permute.xlu0 %1935  ;;  %v1556_v1 = vpack.c.bf16 %v942_v10, %v937_v3  ;;  %v1554_v18 = vpack.c.bf16 %v943_v7, %v938_v2  ;;  %v939_v49 = vsel %vm934_vm8, %v1913_v9, %v1932_v31 }
 0x24d   : > { %v1923_v53 = vunpack.i.h.bf16 %v1921_v52  ;;  %v1922_v37 = vunpack.i.l.bf16 %v1921_v52  ;;  %v1938_v57 = vunpack.i.h.bf16 %v1936_v0  ;;  %v1937_v23 = vunpack.i.l.bf16 %v1936_v0 }
 0x24e   : > { %1579 = vmatpush1.bf16.msra.mxu1 %v1578_v63  ;;  %1555 = vmatprep.subr.bf16.mxu0 %v1554_v18  ;;  %v1584_v47 = vpack.c.bf16 %v944_v58, %v939_v49 }
 0x24f   : > { %v894_v60 = vsel %vm889_vm7, %v1888_v24, %v1922_v37  ;;  %v899_v19 = vsel %vm889_vm7, %v1898_v25, %v1923_v53  ;;  %1580 = vmatprep.subr.bf16.mxu1 %v2175_v62  ;;  %1557 = vmatpush1.bf16.msra.mxu0 %v1556_v1  ;;  %v987_v17 = vsel %vm979_vm9, %v1823_v46, %v1937_v23  ;;  %v3011_v25 = vunpack.i.h.bf16 %v2596_v12 }
 0x250   : > { %v1581_v36 = vpack.c.bf16 %v899_v19, %v894_v60  ;;  %v1926_v42 = vpop.permute.xlu1 %1925  ;;  %v988_v38 = vsel %vm979_vm9, %v1937_v23, %v1938_v57 }
 0x251   : > { %v1928_v48 = vunpack.i.h.bf16 %v1926_v42  ;;  %v1927_v6 = vunpack.i.l.bf16 %v1926_v42 }
 0x252   : > { %1582 = vmatpush1.bf16.msra.mxu1 %v1581_v36 }
 0x253   : > { %v982_v24 = vsel %vm979_vm9, %v3011_v25, %v1927_v6  ;;  %1583 = vmatprep.subr.bf16.mxu1 %v2175_v62  ;;  %v983_v11 = vsel %vm979_vm9, %v1927_v6, %v1928_v48 }
 0x254   : > { %v1560_v21 = vpack.c.bf16 %v987_v17, %v982_v24  ;;  %v1941_v40 = vpop.permute.xlu1 %1940  ;;  %v1558_v27 = vpack.c.bf16 %v988_v38, %v983_v11 }
 0x255   : > { %v1943_v34 = vunpack.i.h.bf16 %v1941_v40  ;;  %v1942_v39 = vunpack.i.l.bf16 %v1941_v40 }
 0x256   : > { %1559 = vmatprep.subr.bf16.mxu0 %v1558_v27  ;;  %1585 = vmatpush1.bf16.msra.mxu1 %v1584_v47 }
 0x257   : > { %v984_v59 = vsel %vm979_vm9, %v1928_v48, %v1942_v39  ;;  %v989_v12 = vsel %vm979_vm9, %v1938_v57, %v1943_v34  ;;  %1561 = vmatpush1.bf16.msra.mxu0 %v1560_v21  ;;  %1586 = vmatprep.subr.bf16.mxu1 %v2175_v62 }
 0x258   : > { %v1587_v46 = vpack.c.bf16 %v989_v12, %v984_v59 }
 0x25a   : > { %1176 = vmatmul.mubr.f32.vlgmr.msra.gmra.mrb[12].mxu0 %v2739_v30  ;;  %1588 = vmatpush1.bf16.msra.mxu1 %v1587_v46 }
 0x25b   : > { %1457 = vmatprep.mubr.msk.f32.mxu0 %vm1021_vm1, %v2541_v41 }
 0x25d   : > { %1259 = vmatmul.mubr.f32.vlgmr.msra.gmra.mrb[6].mxu1 %v2739_v30  ;;  %v1009_v62 = vpop.permute.xlu0 %1008 }
 0x25e   : > { %1182 = vmatmul.mubr.f32.gmra.mrb[14].mxu0 %v2763_v16  ;;  %1460 = vmatprep.mubr.msk.f32.mxu1 %vm1021_vm1, %v2541_v41 }
 0x25f   : > { %1458 = vmatprep.mubr.msk.f32.mxu0 %vm1021_vm1, %v2546_v43 }
 0x261   : > { %1264 = vmatmul.mubr.f32.gmra.mrb[8].mxu1 %v2763_v16 }
 0x262   : > { %1188 = vmatmul.mubr.f32.gmra.mrb[16].mxu0 %v2794_v32  ;;  %1461 = vmatprep.mubr.msk.f32.mxu1 %vm1021_vm1, %v2546_v43 }
 0x265   : > { %1269 = vmatmul.mubr.f32.gmra.mrb[10].mxu1 %v2794_v32  ;;  %v1014_v50 = vpop.permute.xlu1 %1013 }
 0x269   : > { %v1019_v20 = vpop.permute.xlu1 %1018 }
 0x309   : > { %v1094_v30 = vpop.f32.mrb[0].mxu1 }
 0x30a   : > { %v1095_v44 = vadd.f32 %v1094_v30, %v1009_v62  ;;  %v1096_v15 = vpop.f32.mrb[1].mxu1 }
 0x30b   : > { %v1097_v54 = vadd.f32 %v1096_v15, %v1009_v62 }
 0x30c   : > { %1274 = vst [vmem:[%s2894_s27] sm:$0xff] %v1095_v44 }
 0x30d   : > { %1275 = vst [vmem:[%s2894_s27 + $0x8] sm:$0xff] %v1097_v54  ;;  %v1100_v41 = vpop.f32.mrb[2].mxu1 }
 0x30e   : > { %v1101_v43 = vadd.f32 %v1100_v41, %v1014_v50  ;;  %v1102_v16 = vpop.f32.mrb[3].mxu1 }
 0x30f   : > { %v1103_v32 = vadd.f32 %v1102_v16, %v1014_v50 }
 0x310   : > { %1279 = vst [vmem:[%s2894_s27 + $0x28] sm:$0xff] %v1101_v43 }
 0x311   : > { %1280 = vst [vmem:[%s2894_s27 + $0x30] sm:$0xff] %v1103_v32  ;;  %v1106_v26 = vpop.f32.mrb[4].mxu1 }
 0x312   : > { %v1107_v28 = vadd.f32 %v1106_v26, %v1019_v20  ;;  %v1108_v55 = vpop.f32.mrb[5].mxu1 }
 0x313   : > { %v1109_v5 = vadd.f32 %v1108_v55, %v1019_v20 }
 0x314   : > { %1284 = vst [vmem:[%s2894_s27 + $0x50] sm:$0xff] %v1107_v28 }
 0x315   : > { %1285 = vst [vmem:[%s2894_s27 + $0x58] sm:$0xff] %v1109_v5 }
 0x32d   : > { %v1177_v22 = vpop.f32.mrb[12].mxu0 }
 0x32e   : > { %v1178_v45 = vadd.f32 %v1177_v22, %v1009_v62  ;;  %v1179_v33 = vpop.f32.mrb[13].mxu0 }
 0x32f   : > { %v1180_v56 = vadd.f32 %v1179_v33, %v1009_v62 }
 0x330   : > { %1276 = vst [vmem:[%s2894_s27 + $0x10] sm:$0xff] %v1178_v45  ;;  %v1260_v29 = vpop.f32.mrb[6].mxu1 }
 0x331   : > { %1277 = vst [vmem:[%s2894_s27 + $0x18] sm:$0xff] %v1180_v56  ;;  %v1261_v9 = vadd.f32 %v1260_v29, %v1009_v62  ;;  %v1262_v14 = vpop.f32.mrb[7].mxu1  ;;  %v1183_v51 = vpop.f32.mrb[14].mxu0 }
 0x332   : > { %v1184_v61 = vadd.f32 %v1183_v51, %v1014_v50  ;;  %v1185_v35 = vpop.f32.mrb[15].mxu0 }
 0x333   : > { %1278 = vst [vmem:[%s2894_s27 + $0x20] sm:$0xff] %v1261_v9  ;;  %v1186_v8 = vadd.f32 %v1185_v35, %v1014_v50 }
 0x334   : > { %1281 = vst [vmem:[%s2894_s27 + $0x38] sm:$0xff] %v1184_v61  ;;  %v1265_v4 = vpop.f32.mrb[8].mxu1 }
 0x335   : > { %1282 = vst [vmem:[%s2894_s27 + $0x40] sm:$0xff] %v1186_v8  ;;  %v1266_v63 = vadd.f32 %v1265_v4, %v1014_v50  ;;  %v1189_v10 = vpop.f32.mrb[16].mxu0  ;;  %v1267_v3 = vpop.f32.mrb[9].mxu1 }
 0x336   : > { %v1190_v13 = vadd.f32 %v1189_v10, %v1019_v20  ;;  %v1191_v52 = vpop.f32.mrb[17].mxu0 }
 0x337   : > { %1283 = vst [vmem:[%s2894_s27 + $0x48] sm:$0xff] %v1266_v63  ;;  %v1192_v0 = vadd.f32 %v1191_v52, %v1019_v20 }
 0x338   : > { %1286 = vst [vmem:[%s2894_s27 + $0x60] sm:$0xff] %v1190_v13  ;;  %v1270_v2 = vpop.f32.mrb[10].mxu1 }
 0x339   : > { %1287 = vst [vmem:[%s2894_s27 + $0x68] sm:$0xff] %v1192_v0  ;;  %v1271_v7 = vadd.f32 %v1270_v2, %v1019_v20  ;;  %v1272_v1 = vpop.f32.mrb[11].mxu1 }
 0x33b   : > { %1288 = vst [vmem:[%s2894_s27 + $0x70] sm:$0xff] %v1271_v7 }
 0x33c   : > { %2075 = shalt.err (!%p2072_p5)
}
 0x33d   : > { %s2076_s11 = scalar_lea.hbm %s2914_s28, 1920  ;;  %s2080_s5 = scalar_lea.hbm %s3012_s6, 3840 }
 0x33e   : > { %p2077_p10 = scmp.ne.s32.totalorder %s2914_s28, %s2076_s11  ;;  %p2081_p9 = scmp.lt.u32.totalorder %s2914_s28, %s3012_s6 }
 0x33f   : > { %p2082_p0 = scmp.lt.u32.totalorder %s2080_s5, %s2076_s11  ;;  %p2084_p6 = scmp.lt.u32.totalorder %s2076_s11, %s2914_s28 }
 0x340   : > { %p2078_p3 = pnand %p2077_p10, %p3013_p13 }
 0x341   : > { %p2083_p8 = por %p2082_p0, %p2081_p9 }
 0x342   : > { %p2079_p7 = pneg %p2078_p3 }
 0x343   : > { %p2085_p11 = por %p2084_p6, %p2083_p8 }
 0x345   : > { %p2086_p4 = pnand %p2085_p11, %p2079_p7 }
 0x347   : > { %2089 = shalt.err (!%p2086_p4)
}
 0x348   : > { %s2177_s22 = smov 640   ;;  %s2178_s30 = smov 40  }
 0x349   : > { %1606 = dma.vmem_to_hbm [thread:$0]  (%p3013_p13), %s2917_s0, 1920, %s2914_s28, %s1290_s18, %s2177_s22, %s2177_s22, %s2178_s30  }
 0x34a PF: > { %s3014_s23 = sld [smem:[#allocation14_spill]]  ;;  %s3015_s27 = sld [smem:[#allocation15_spill]] }
 0x34b   : > { %p3017_p1 = scmp.ge.s32.totalorder %s2152_s20, 2 }
 0x350   : > { %s1321_s13 = sand.u32 1, %s3014_s23   ;;  %p3016_p12 = scmp.ne.s32.totalorder %s3015_s27, 0 }
 0x351   : > { %s1322_s29 = scalar_lea.sflag [#allocation4], %s1321_s13 }
 0x352   : > { %p1623_p2 = pnand %p3017_p1, %p3016_p12 }
 0x354   : > { %2127 = dma.done.wait (!%p1623_p2), %s1322_s29, 1920  }
 0x355   : > { %2129 = vsyncadd (!%p1623_p2), %s1322_s29, 4294965376  ;;  %s19_s20 = sadd.s32 1, %s2152_s20   ;;  %s3018_s15 = smov %s2136_s16 }
 0x356   : > { %p16_p5 = scmp.ge.s32.totalorder %s19_s20, 4   ;;  %s3019_s16 = smov %s2140_s17 }
 0x357   : > { %s3020_s17 = smov %s2334_s4  ;;  %s3021_s18 = smov %s2148_s19 }
 0x358   : > { %s3022_s19 = smov %s3024_s7  ;;  %18 = sbr.rel (!%p16_p5) target bundleno = 10 (0xa), region = 101 }
 0x35f   :  { %1327 = vsyncpa [#allocation3], 1 }
 0x360   :  { %1329 = vsyncpa [#allocation3 + $0x1], 1 }
 0x361   :  { %1330 = vsyncpa [#allocation6], 1 }
 0x362   :  { %1331 = vsyncpa [#allocation4], 1 }
 0x363   :  { %1333 = vsyncpa [#allocation4 + $0x1], 1 }

</bundles_post_ra>
